<compile_context>
chip_gen: v7x
topology: tpu7x:2x2x1
jax: 0.10.0
libtpu: 0.0.40
codegen_flags: <defaults>
</compile_context>

<pallas_src>
import functools
import math

import jax
import jax.numpy as jnp
from jax.experimental import pallas as pl
from jax.experimental.pallas import tpu as pltpu

LN_EPS = 1e-5  # PyTorch nn.LayerNorm default


def _round_up(x, m):
    return ((x + m - 1) // m) * m


def _pick_tile(total, max_tile):
    """Largest ~max_tile tile (multiple of 8) that minimizes padded rows."""
    nt = max(1, -(-total // max_tile))
    t = _round_up(-(-total // nt), 8)
    return t, nt * t


def _vmem_limit_bytes(per_step_bytes):
    # double-buffered pipeline stages + headroom, clamped to sane bounds.
    est = 2 * per_step_bytes + (4 << 20)
    return int(min(100 << 20, max(32 << 20, est)))


def _gelu_tanh(x):
    # TODO(synk): PyTorch nn.GELU() default is the exact erf formulation;
    # the tanh approximation is used here (guaranteed Mosaic lowering).
    c = math.sqrt(2.0 / math.pi)
    return 0.5 * x * (1.0 + jnp.tanh(c * (x + 0.044715 * x * x * x)))


# ---------------------------------------------------------------------------
# Kernel 1: fused LayerNorm + Linear (to_q, and fused to_k + to_v)
# ---------------------------------------------------------------------------
def _ln_linear_body(x_ref, g_ref, b_ref, w_ref, bias_ref, o_ref):
    x = x_ref[...].astype(jnp.float32)                        # (tm, din)
    mu = jnp.mean(x, axis=-1, keepdims=True)
    xc = x - mu
    var = jnp.mean(xc * xc, axis=-1, keepdims=True)
    xn = xc * jax.lax.rsqrt(var + LN_EPS)
    h = xn * g_ref[...].astype(jnp.float32) + b_ref[...].astype(jnp.float32)
    # keep MXU operands in the weight dtype; accumulate in f32.
    y = jnp.dot(h.astype(w_ref.dtype), w_ref[...],
                preferred_element_type=jnp.float32)
    o_ref[...] = (y + bias_ref[...].astype(jnp.float32)).astype(o_ref.dtype)


def _ln_linear_kernel(x_ref, g_ref, b_ref, w_ref, bias_ref, o_ref):
    _ln_linear_body(x_ref, g_ref, b_ref, w_ref, bias_ref, o_ref)


def _ln_linear_kv_kernel(xk_ref, xv_ref,
                         gk_ref, bk_ref, wk_ref, wkb_ref,
                         gv_ref, bv_ref, wv_ref, wvb_ref,
                         ok_ref, ov_ref):
    _ln_linear_body(xk_ref, gk_ref, bk_ref, wk_ref, wkb_ref, ok_ref)
    _ln_linear_body(xv_ref, gv_ref, bv_ref, wv_ref, wvb_ref, ov_ref)


def ln_linear(x2d, gamma, beta, w, bias, *, block_rows=1024):
    """LayerNorm over the last dim followed by a dense layer.  x2d: (M, din)."""
    M, din = x2d.shape
    dout = w.shape[1]
    tm, Mp = _pick_tile(M, block_rows)
    if Mp != M:
        x2d = jnp.pad(x2d, ((0, Mp - M), (0, 0)))
    row = lambda i: (i, 0)
    const = lambda i: (0, 0)
    isz = jnp.dtype(x2d.dtype).itemsize
    wsz = jnp.dtype(w.dtype).itemsize
    per_step = (tm * din + tm * dout) * isz + (din * dout + 2 * din + dout) * wsz
    out = pl.pallas_call(
        _ln_linear_kernel,
        out_shape=jax.ShapeDtypeStruct((Mp, dout), x2d.dtype),
        grid_spec=pltpu.PrefetchScalarGridSpec(
            num_scalar_prefetch=0,
            grid=(Mp // tm,),
            in_specs=[
                pl.BlockSpec((tm, din), row),
                pl.BlockSpec((1, din), const),
                pl.BlockSpec((1, din), const),
                pl.BlockSpec((din, dout), const),
                pl.BlockSpec((1, dout), const),
            ],
            out_specs=pl.BlockSpec((tm, dout), row),
        ),
        compiler_params=pltpu.CompilerParams(
            dimension_semantics=("parallel",),
            vmem_limit_bytes=_vmem_limit_bytes(per_step)),
    )(x2d, gamma.reshape(1, din), beta.reshape(1, din), w,
      bias.reshape(1, dout))
    return out[:M]


def ln_linear_kv(xk2d, xv2d, to_k, to_v, *, block_rows=1024):
    """Fused to_k / to_v: one pipeline over the shared M = b*n*K rows."""
    gk, bk, wk, wkb = to_k
    gv, bv, wv, wvb = to_v
    M, din = xk2d.shape
    dout = wk.shape[1]
    tm, Mp = _pick_tile(M, block_rows)
    if Mp != M:
        xk2d = jnp.pad(xk2d, ((0, Mp - M), (0, 0)))
        xv2d = jnp.pad(xv2d, ((0, Mp - M), (0, 0)))
    row = lambda i: (i, 0)
    const = lambda i: (0, 0)
    isz = jnp.dtype(xk2d.dtype).itemsize
    wsz = jnp.dtype(wk.dtype).itemsize
    per_step = (2 * tm * din + 2 * tm * dout) * isz \
        + 2 * (din * dout + 2 * din + dout) * wsz
    kp, vp = pl.pallas_call(
        _ln_linear_kv_kernel,
        out_shape=(jax.ShapeDtypeStruct((Mp, dout), xk2d.dtype),
                   jax.ShapeDtypeStruct((Mp, dout), xv2d.dtype)),
        grid_spec=pltpu.PrefetchScalarGridSpec(
            num_scalar_prefetch=0,
            grid=(Mp // tm,),
            in_specs=[
                pl.BlockSpec((tm, din), row),
                pl.BlockSpec((tm, din), row),
                pl.BlockSpec((1, din), const),
                pl.BlockSpec((1, din), const),
                pl.BlockSpec((din, dout), const),
                pl.BlockSpec((1, dout), const),
                pl.BlockSpec((1, din), const),
                pl.BlockSpec((1, din), const),
                pl.BlockSpec((din, dout), const),
                pl.BlockSpec((1, dout), const),
            ],
            out_specs=(pl.BlockSpec((tm, dout), row),
                       pl.BlockSpec((tm, dout), row)),
        ),
        compiler_params=pltpu.CompilerParams(
            dimension_semantics=("parallel",),
            vmem_limit_bytes=_vmem_limit_bytes(per_step)),
    )(xk2d, xv2d,
      gk.reshape(1, din), bk.reshape(1, din), wk, wkb.reshape(1, dout),
      gv.reshape(1, din), bv.reshape(1, din), wv, wvb.reshape(1, dout))
    return kp[:M], vp[:M]


# ---------------------------------------------------------------------------
# Kernel 2: cross-camera attention, heads merged in-block.
#   q block: (1, n, tq, hd)  k block: (1, n, K, hd)  v block: (1, n*K, hd)
#   o block: (1, tq, hd)     att block: (1, heads, tq, n*K)  (optional)
# The softmax is joint over the concatenated (camera, key) axis; scores are
# laid out directly as (tq, n*K) so the attention map is written in its
# final lane-dense layout.  The attention scale is pre-folded into to_q.
# ---------------------------------------------------------------------------
def _attention_kernel(q_ref, k_ref, v_ref, *out_refs, heads, dim_head,
                      emit_att):
    o_ref = out_refs[0]
    att_ref = out_refs[1] if emit_att else None
    n = q_ref.shape[1]

    qblk = q_ref[0]                                            # (n, tq, hd)
    kblk = k_ref[0]                                            # (n, K, hd)
    vblk = v_ref[0]                                            # (n*K, hd)

    outs = []
    for h in range(heads):
        lo = h * dim_head
        hi = lo + dim_head
        # per-camera QK^T, concatenated camera-major -> (tq, n*K)
        s_parts = []
        for c in range(n):
            qc = qblk[c, :, lo:hi]                             # (tq, dh)
            kc = kblk[c, :, lo:hi]                             # (K, dh)
            s_parts.append(jax.lax.dot_general(
                qc, kc, (((1,), (1,)), ((), ())),
                preferred_element_type=jnp.float32))
        s = jnp.concatenate(s_parts, axis=-1) if n > 1 else s_parts[0]
        m = jnp.max(s, axis=-1, keepdims=True)
        p = jnp.exp(s - m)
        l = jnp.sum(p, axis=-1, keepdims=True)
        inv = pl.reciprocal(l, approx=True)                    # EUP slot
        vh = vblk[:, lo:hi]                                    # (n*K, dh)
        # PV on unnormalized p; scale only the small (tq, dh) result.
        acc = jnp.dot(p.astype(vh.dtype), vh,
                      preferred_element_type=jnp.float32)
        outs.append(acc * inv)
        if emit_att:
            att_ref[0, h] = (p * inv).astype(att_ref.dtype)
    o_ref[0] = jnp.concatenate(outs, axis=-1).astype(o_ref.dtype)


def multihead_cross_attention(qp, kp, vp, *, heads, dim_head, block_q=128,
                              return_att=True, att_dtype=None):
    """qp: (b, n, Q, hd)  kp: (b, n, K, hd)  vp: (b, n*K, hd).

    Returns (a, att) with a: (b, Q, hd) and att: (b, heads, Q, n*K) (or None).
    """
    b, n, Q, hd = qp.shape
    K = kp.shape[2]
    att_dtype = qp.dtype if att_dtype is None else att_dtype
    tq, Qp = _pick_tile(Q, block_q)
    if Qp != Q:
        qp = jnp.pad(qp, ((0, 0), (0, 0), (0, Qp - Q), (0, 0)))

    kernel = functools.partial(_attention_kernel, heads=heads,
                               dim_head=dim_head, emit_att=return_att)

    out_shapes = [jax.ShapeDtypeStruct((b, Qp, hd), qp.dtype)]
    out_specs = [pl.BlockSpec((1, tq, hd), lambda i, j: (i, j, 0))]
    if return_att:
        out_shapes.append(jax.ShapeDtypeStruct((b, heads, Qp, n * K),
                                               att_dtype))
        out_specs.append(pl.BlockSpec((1, heads, tq, n * K),
                                      lambda i, j: (i, 0, j, 0)))

    isz = jnp.dtype(qp.dtype).itemsize
    per_step = (n * tq * hd + n * K * hd + n * K * hd + tq * hd) * isz
    if return_att:
        per_step += heads * tq * n * K * jnp.dtype(att_dtype).itemsize

    results = pl.pallas_call(
        kernel,
        out_shape=tuple(out_shapes),
        grid_spec=pltpu.PrefetchScalarGridSpec(
            num_scalar_prefetch=0,
            grid=(b, Qp // tq),
            in_specs=[
                pl.BlockSpec((1, n, tq, hd), lambda i, j: (i, 0, j, 0)),
                pl.BlockSpec((1, n, K, hd), lambda i, j: (i, 0, 0, 0)),
                pl.BlockSpec((1, n * K, hd), lambda i, j: (i, 0, 0)),
            ],
            out_specs=tuple(out_specs),
        ),
        compiler_params=pltpu.CompilerParams(
            dimension_semantics=("parallel", "parallel"),
            vmem_limit_bytes=_vmem_limit_bytes(per_step)),
    )(qp, kp, vp)

    if not isinstance(results, (tuple, list)):
        results = (results,)
    a = results[0][:, :Q]
    att = None
    if return_att:
        att = results[1]
        if Qp != Q:
            att = att[:, :, :Q]
    return a, att


# ---------------------------------------------------------------------------
# Kernel 3: fused epilogue: proj + skip + prenorm + MLP(GELU) + residual
#           + postnorm, tiled over rows.
# ---------------------------------------------------------------------------
def _out_block_kernel(a_ref, skip_ref, wp_ref, bp_ref, g1_ref, be1_ref,
                      w1_ref, b1_ref, w2_ref, b2_ref, g2_ref, be2_ref, o_ref):
    def ln(x, g_ref, b_ref):
        mu = jnp.mean(x, axis=-1, keepdims=True)
        xc = x - mu
        var = jnp.mean(xc * xc, axis=-1, keepdims=True)
        return (xc * jax.lax.rsqrt(var + LN_EPS)
                * g_ref[...].astype(jnp.float32)
                + b_ref[...].astype(jnp.float32))

    a = a_ref[...]                                             # (tm, hd)
    z = jnp.dot(a, wp_ref[...], preferred_element_type=jnp.float32)
    z = z + bp_ref[...].astype(jnp.float32) + skip_ref[...].astype(jnp.float32)
    z = ln(z, g1_ref, be1_ref)                                 # f32 (tm, dim)
    h = jnp.dot(z.astype(w1_ref.dtype), w1_ref[...],
                preferred_element_type=jnp.float32) + b1_ref[...].astype(jnp.float32)
    h = _gelu_tanh(h)
    z = z + jnp.dot(h.astype(w2_ref.dtype), w2_ref[...],
                    preferred_element_type=jnp.float32) + b2_ref[...].astype(jnp.float32)
    z = ln(z, g2_ref, be2_ref)
    o_ref[...] = z.astype(o_ref.dtype)


def out_block(a2d, skip2d, params, *, block_rows=1024):
    wp, bp = params['proj']
    g1, be1 = params['prenorm']
    w1, b1m, w2, b2m = params['mlp']
    g2, be2 = params['postnorm']
    M, hd = a2d.shape
    dim = wp.shape[1]
    hidden = w1.shape[1]
    tm, Mp = _pick_tile(M, block_rows)
    if Mp != M:
        a2d = jnp.pad(a2d, ((0, Mp - M), (0, 0)))
        skip2d = jnp.pad(skip2d, ((0, Mp - M), (0, 0)))
    row = lambda i: (i, 0)
    const = lambda i: (0, 0)
    isz = jnp.dtype(a2d.dtype).itemsize
    wsz = jnp.dtype(wp.dtype).itemsize
    per_step = (tm * hd + 2 * tm * dim) * isz \
        + (hd * dim + dim * hidden + hidden * dim + 6 * dim + hidden) * wsz
    out = pl.pallas_call(
        _out_block_kernel,
        out_shape=jax.ShapeDtypeStruct((Mp, dim), a2d.dtype),
        grid_spec=pltpu.PrefetchScalarGridSpec(
            num_scalar_prefetch=0,
            grid=(Mp // tm,),
            in_specs=[
                pl.BlockSpec((tm, hd), row),
                pl.BlockSpec((tm, dim), row),
                pl.BlockSpec((hd, dim), const),
                pl.BlockSpec((1, dim), const),
                pl.BlockSpec((1, dim), const),
                pl.BlockSpec((1, dim), const),
                pl.BlockSpec((dim, hidden), const),
                pl.BlockSpec((1, hidden), const),
                pl.BlockSpec((hidden, dim), const),
                pl.BlockSpec((1, dim), const),
                pl.BlockSpec((1, dim), const),
                pl.BlockSpec((1, dim), const),
            ],
            out_specs=pl.BlockSpec((tm, dim), row),
        ),
        compiler_params=pltpu.CompilerParams(
            dimension_semantics=("parallel",),
            vmem_limit_bytes=_vmem_limit_bytes(per_step)),
    )(a2d, skip2d, wp, bp.reshape(1, dim), g1.reshape(1, dim),
      be1.reshape(1, dim), w1, b1m.reshape(1, hidden), w2,
      b2m.reshape(1, dim), g2.reshape(1, dim), be2.reshape(1, dim))
    return out[:M]


# ---------------------------------------------------------------------------
# Full CrossAttention forward
# ---------------------------------------------------------------------------
def cross_attention_forward(params, q, k, v, skip=None, *, return_att=True,
                            block_q=128, block_rows=1024):
    heads, dim_head = params['heads'], params['dim_head']
    b, n, dim, Hq, Wq = q.shape
    _, _, _, h_kv, w_kv = k.shape
    Q, K = Hq * Wq, h_kv * w_kv
    hd = heads * dim_head
    scale = dim_head ** (-0.5)

    # Fold the attention scale into the to_q projection (identical scores).
    gq, bq, wq_w, wq_b = params['to_q']
    to_q_scaled = (gq, bq, wq_w * scale, wq_b * scale)

    # 'b n d H W -> b n (H W) d' (layout plumbing stays in the wrapper)
    q_seq = q.transpose(0, 1, 3, 4, 2).reshape(b * n * Q, dim)
    k_seq = k.transpose(0, 1, 3, 4, 2).reshape(b * n * K, dim)
    v_seq = v.transpose(0, 1, 3, 4, 2).reshape(b * n * K, dim)

    qp = ln_linear(q_seq, *to_q_scaled, block_rows=block_rows) \
        .reshape(b, n, Q, hd)
    kp, vp = ln_linear_kv(k_seq, v_seq, params['to_k'], params['to_v'],
                          block_rows=block_rows)
    kp = kp.reshape(b, n, K, hd)
    vp = vp.reshape(b, n * K, hd)

    # Heads stay merged (hd lanes); no head split/merge transposes needed.
    a, att = multihead_cross_attention(qp, kp, vp, heads=heads,
                                       dim_head=dim_head, block_q=block_q,
                                       return_att=return_att)

    if skip is not None:
        skip_seq = skip.transpose(0, 2, 3, 1).reshape(b * Q, dim)
    else:
        skip_seq = jnp.zeros((b * Q, dim), a.dtype)

    z = out_block(a.reshape(b * Q, hd), skip_seq, params,
                  block_rows=block_rows)
    z = z.reshape(b, Hq, Wq, dim).transpose(0, 3, 1, 2)        # 'b (H W) d -> b d H W'

    if return_att:
        att = att.reshape(b * heads, Q, n * K)                 # free reshape
    return z, att


# ---------------------------------------------------------------------------
# Pure-JAX reference (mirrors the PyTorch math; gelu = same tanh approx)
# ---------------------------------------------------------------------------
def reference_forward(params, q, k, v, skip):
    heads, dim_head = params['heads'], params['dim_head']
    b, n, dim, Hq, Wq = q.shape
    _, _, _, h_kv, w_kv = k.shape
    Q, K = Hq * Wq, h_kv * w_kv
    hd = heads * dim_head
    scale = dim_head ** (-0.5)
    hp = jax.lax.Precision.HIGHEST

    def ln(x, g, be):
        mu = x.mean(-1, keepdims=True)
        var = ((x - mu) ** 2).mean(-1, keepdims=True)
        return (x - mu) / jnp.sqrt(var + LN_EPS) * g + be

    qs = q.transpose(0, 1, 3, 4, 2).reshape(b, n, Q, dim)
    ks = k.transpose(0, 1, 3, 4, 2).reshape(b, n, K, dim)
    vs = v.transpose(0, 1, 3, 4, 2).reshape(b, n * K, dim)

    gq, bq, wq_w, wq_b = params['to_q']
    gk, bk, wk_w, wk_b = params['to_k']
    gv, bv, wv_w, wv_b = params['to_v']
    qp = jnp.matmul(ln(qs, gq, bq), wq_w, precision=hp) + wq_b
    kp = jnp.matmul(ln(ks, gk, bk), wk_w, precision=hp) + wk_b
    vp = jnp.matmul(ln(vs, gv, bv), wv_w, precision=hp) + wv_b

    qh = qp.reshape(b, n, Q, heads, dim_head).transpose(0, 3, 1, 2, 4) \
           .reshape(b * heads, n, Q, dim_head)
    kh = kp.reshape(b, n, K, heads, dim_head).transpose(0, 3, 1, 2, 4) \
           .reshape(b * heads, n, K, dim_head)
    vh = vp.reshape(b, n * K, heads, dim_head).transpose(0, 2, 1, 3) \
           .reshape(b * heads, n * K, dim_head)

    dot = scale * jnp.einsum('bnqd,bnkd->bnqk', qh, kh, precision=hp)
    dot = dot.transpose(0, 2, 1, 3).reshape(b * heads, Q, n * K)
    att = jax.nn.softmax(dot, axis=-1)
    a = jnp.einsum('bqk,bkd->bqd', att, vh, precision=hp)
    a = a.reshape(b, heads, Q, dim_head).transpose(0, 2, 1, 3).reshape(b, Q, hd)

    wp_w, wp_b = params['proj']
    z = jnp.matmul(a, wp_w, precision=hp) + wp_b
    if skip is not None:
        z = z + skip.transpose(0, 2, 3, 1).reshape(b, Q, dim)
    g1, be1 = params['prenorm']
    z = ln(z, g1, be1)
    w1_w, w1_b, w2_w, w2_b = params['mlp']
    hmid = _gelu_tanh(jnp.matmul(z, w1_w, precision=hp) + w1_b)
    z = z + jnp.matmul(hmid, w2_w, precision=hp) + w2_b
    g2, be2 = params['postnorm']
    z = ln(z, g2, be2)
    z = z.reshape(b, Hq, Wq, dim).transpose(0, 3, 1, 2)
    return z, att


if __name__ == "__main__":
    b, n, dim = 2, 2, 32
    heads, dim_head = 4, 32       # hd = 128 -> lane-dense blocks
    Hq, Wq = 4, 4                 # query spatial
    h_kv, w_kv = 2, 4             # key/value spatial
    hd = heads * dim_head

    key = jax.random.PRNGKey(0)
    ks = jax.random.split(key, 23)

    def lin(k0, k1, din, dout, s=0.2):
        return (s * jax.random.normal(k0, (din, dout), jnp.float32),
                s * jax.random.normal(k1, (dout,), jnp.float32))

    def norm_p(k0, k1, d):
        return (1.0 + 0.1 * jax.random.normal(k0, (d,), jnp.float32),
                0.1 * jax.random.normal(k1, (d,), jnp.float32))

    gq, bq = norm_p(ks[0], ks[1], dim); wq_w, wq_b = lin(ks[2], ks[3], dim, hd)
    gk, bk = norm_p(ks[4], ks[5], dim); wk_w, wk_b = lin(ks[6], ks[7], dim, hd)
    gv, bv = norm_p(ks[8], ks[9], dim); wv_w, wv_b = lin(ks[10], ks[11], dim, hd)
    wp_w, wp_b = lin(ks[12], ks[13], hd, dim)
    g1, be1 = norm_p(ks[14], ks[15], dim)
    w1_w, w1_b = lin(ks[16], ks[17], dim, 2 * dim)
    w2_w, w2_b = lin(ks[18], ks[19], 2 * dim, dim)
    g2, be2 = norm_p(ks[20], ks[21], dim)

    params = {
        'heads': heads, 'dim_head': dim_head,
        'to_q': (gq, bq, wq_w, wq_b),
        'to_k': (gk, bk, wk_w, wk_b),
        'to_v': (gv, bv, wv_w, wv_b),
        'proj': (wp_w, wp_b),
        'prenorm': (g1, be1),
        'mlp': (w1_w, w1_b, w2_w, w2_b),
        'postnorm': (g2, be2),
    }

    kq, kk, kv, ksk = jax.random.split(ks[22], 4)
    q = jax.random.normal(kq, (b, n, dim, Hq, Wq), jnp.float32)
    k = jax.random.normal(kk, (b, n, dim, h_kv, w_kv), jnp.float32)
    v = jax.random.normal(kv, (b, n, dim, h_kv, w_kv), jnp.float32)
    skip = jax.random.normal(ksk, (b, dim, Hq, Wq), jnp.float32)

    z, att = cross_attention_forward(params, q, k, v, skip, return_att=True)
    z, att = jax.block_until_ready((z, att))

    # also exercise the flash-style no-att path
    z2, _ = cross_attention_forward(params, q, k, v, skip, return_att=False)
    z2 = jax.block_until_ready(z2)

    z_ref, att_ref = reference_forward(params, q, k, v, skip)

    assert z.shape == (b, dim, Hq, Wq)
    assert att.shape == (b * heads, Hq * Wq, n * h_kv * w_kv)
    assert jnp.allclose(z, z_ref, atol=2e-2, rtol=2e-2), \
        float(jnp.max(jnp.abs(z - z_ref)))
    assert jnp.allclose(att, att_ref, atol=2e-2, rtol=2e-2), \
        float(jnp.max(jnp.abs(att - att_ref)))
    assert jnp.allclose(z2, z_ref, atol=2e-2, rtol=2e-2), \
        float(jnp.max(jnp.abs(z2 - z_ref)))

    print("KERNEL_OK")
</pallas_src>

<mosaic_0001>
module attributes {stable_mosaic.version = 11 : i64} {
  func.func @_ln_linear_kernel(%arg0: i32, %arg1: memref<64x32xf32, #tpu.memory_space<vmem>>, %arg2: memref<1x32xf32, #tpu.memory_space<vmem>>, %arg3: memref<1x32xf32, #tpu.memory_space<vmem>>, %arg4: memref<32x128xf32, #tpu.memory_space<vmem>>, %arg5: memref<1x128xf32, #tpu.memory_space<vmem>>, %arg6: memref<64x128xf32, #tpu.memory_space<vmem>>) attributes {dimension_semantics = [#tpu.dimension_semantics<parallel>], iteration_bounds = array<i64: 1>, scalar_prefetch = 0 : i64, scratch_operands = 0 : i64, tpu.core_type = #tpu.core_type<tc>, window_params = [{transform_indices = @transform_0, window_bounds = array<i64: 64, 32>}, {pipeline_mode = #tpu.pipeline_mode<synchronous>, transform_indices = @transform_1, window_bounds = array<i64: 1, 32>}, {pipeline_mode = #tpu.pipeline_mode<synchronous>, transform_indices = @transform_2, window_bounds = array<i64: 1, 32>}, {pipeline_mode = #tpu.pipeline_mode<synchronous>, transform_indices = @transform_3, window_bounds = array<i64: 32, 128>}, {pipeline_mode = #tpu.pipeline_mode<synchronous>, transform_indices = @transform_4, window_bounds = array<i64: 1, 128>}, {transform_indices = @transform_5, window_bounds = array<i64: 64, 128>}]} {
    %c0 = arith.constant 0 : index
    %c0_0 = arith.constant 0 : index
    %0 = vector.load %arg1[%c0, %c0_0] : memref<64x32xf32, #tpu.memory_space<vmem>>, vector<64x32xf32>
    %cst = arith.constant dense<0.000000e+00> : vector<64xf32>
    %1 = vector.multi_reduction <add>, %0, %cst [1] : vector<64x32xf32> to vector<64xf32>
    %2 = vector.shape_cast %1 : vector<64xf32> to vector<64x1xf32>
    %cst_1 = arith.constant 3.200000e+01 : f32
    %3 = vector.broadcast %cst_1 : f32 to vector<64x1xf32>
    %4 = arith.divf %2, %3 : vector<64x1xf32>
    %5 = vector.broadcast %4 : vector<64x1xf32> to vector<64x32xf32>
    %6 = arith.subf %0, %5 : vector<64x32xf32>
    %7 = arith.mulf %6, %6 : vector<64x32xf32>
    %cst_2 = arith.constant dense<0.000000e+00> : vector<64xf32>
    %8 = vector.multi_reduction <add>, %7, %cst_2 [1] : vector<64x32xf32> to vector<64xf32>
    %9 = vector.shape_cast %8 : vector<64xf32> to vector<64x1xf32>
    %cst_3 = arith.constant 3.200000e+01 : f32
    %10 = vector.broadcast %cst_3 : f32 to vector<64x1xf32>
    %11 = arith.divf %9, %10 : vector<64x1xf32>
    %cst_4 = arith.constant 9.99999974E-6 : f32
    %12 = vector.broadcast %cst_4 : f32 to vector<64x1xf32>
    %13 = arith.addf %11, %12 : vector<64x1xf32>
    %14 = math.rsqrt %13 : vector<64x1xf32>
    %15 = vector.broadcast %14 : vector<64x1xf32> to vector<64x32xf32>
    %16 = arith.mulf %6, %15 : vector<64x32xf32>
    %c0_5 = arith.constant 0 : index
    %c0_6 = arith.constant 0 : index
    %17 = vector.load %arg2[%c0_5, %c0_6] : memref<1x32xf32, #tpu.memory_space<vmem>>, vector<1x32xf32>
    %18 = vector.broadcast %17 : vector<1x32xf32> to vector<64x32xf32>
    %19 = arith.mulf %16, %18 : vector<64x32xf32>
    %c0_7 = arith.constant 0 : index
    %c0_8 = arith.constant 0 : index
    %20 = vector.load %arg3[%c0_7, %c0_8] : memref<1x32xf32, #tpu.memory_space<vmem>>, vector<1x32xf32>
    %21 = vector.broadcast %20 : vector<1x32xf32> to vector<64x32xf32>
    %22 = arith.addf %19, %21 : vector<64x32xf32>
    %c0_9 = arith.constant 0 : index
    %c0_10 = arith.constant 0 : index
    %23 = vector.load %arg4[%c0_9, %c0_10] : memref<32x128xf32, #tpu.memory_space<vmem>>, vector<32x128xf32>
    %cst_11 = arith.constant dense<0.000000e+00> : vector<64x128xf32>
    %24 = tpu.matmul %22, %23, %cst_11 {dimension_numbers = #tpu.dot_dimension_numbers<[1], [0], [0], [1], [0, 0, 1, 1], [], []>} : vector<64x32xf32>, vector<32x128xf32>, vector<64x128xf32> -> vector<64x128xf32>
    %c0_12 = arith.constant 0 : index
    %c0_13 = arith.constant 0 : index
    %25 = vector.load %arg5[%c0_12, %c0_13] : memref<1x128xf32, #tpu.memory_space<vmem>>, vector<1x128xf32>
    %26 = vector.broadcast %25 : vector<1x128xf32> to vector<64x128xf32>
    %27 = arith.addf %24, %26 : vector<64x128xf32>
    %c0_14 = arith.constant 0 : index
    %c0_15 = arith.constant 0 : index
    %28 = vector.load %arg6[%c0_14, %c0_15] : memref<64x128xf32, #tpu.memory_space<vmem>>, vector<64x128xf32>
    tpu.vector_store %arg6[%c0_14, %c0_15], %27 {strides = array<i32>} : memref<64x128xf32, #tpu.memory_space<vmem>>, vector<64x128xf32>,
    return
  }
  func.func @transform_0(%arg0: i32) -> (i32, i32) {
    %c0_i32 = arith.constant 0 : i32
    %c0_i32_0 = arith.constant 0 : i32
    return %arg0, %c0_i32 : i32, i32
  }
  func.func @transform_1(%arg0: i32) -> (i32, i32) {
    %c0_i32 = arith.constant 0 : i32
    %c0_i32_0 = arith.constant 0 : i32
    %c0_i32_1 = arith.constant 0 : i32
    return %c0_i32, %c0_i32_0 : i32, i32
  }
  func.func @transform_2(%arg0: i32) -> (i32, i32) {
    %c0_i32 = arith.constant 0 : i32
    %c0_i32_0 = arith.constant 0 : i32
    %c0_i32_1 = arith.constant 0 : i32
    return %c0_i32, %c0_i32_0 : i32, i32
  }
  func.func @transform_3(%arg0: i32) -> (i32, i32) {
    %c0_i32 = arith.constant 0 : i32
    %c0_i32_0 = arith.constant 0 : i32
    %c0_i32_1 = arith.constant 0 : i32
    return %c0_i32, %c0_i32_0 : i32, i32
  }
  func.func @transform_4(%arg0: i32) -> (i32, i32) {
    %c0_i32 = arith.constant 0 : i32
    %c0_i32_0 = arith.constant 0 : i32
    %c0_i32_1 = arith.constant 0 : i32
    return %c0_i32, %c0_i32_0 : i32, i32
  }
  func.func @transform_5(%arg0: i32) -> (i32, i32) {
    %c0_i32 = arith.constant 0 : i32
    %c0_i32_0 = arith.constant 0 : i32
    return %arg0, %c0_i32 : i32, i32
  }
}

</mosaic_0001>

<bundles_post_ra>
// kernel: tpu_custom_call.1
= control target key start
LH: loop header
LB: loop body
LE: loop exit
PB: predicated region body
PF: predicated region fallthrough
CT: control target
= control target key end

     0   :  { %vm29_vm0 = vcmask 261120   ;;  %s581_s0 = inlined_call_operand.vmem [shape: f32[64,32], index: 0, kind: input, shape index: {}]   ;;  %s582_s1 = inlined_call_operand.vmem [shape: f32[1,32], index: 1, kind: input, shape index: {}]   ;;  %s583_s2 = inlined_call_operand.vmem [shape: f32[1,32], index: 2, kind: input, shape index: {}]   ;;  %s584_s3 = inlined_call_operand.vmem [shape: f32[32,128], index: 3, kind: input, shape index: {}]   ;;  %s585_s4 = inlined_call_operand.vmem [shape: f32[1,128], index: 4, kind: input, shape index: {}]   ;;  %s586_s5 = inlined_call_operand.hbm [shape: f32[64,128], index: 5, kind: output, shape index: {}]  }
   0x1   :  { %v21_v0 = vld [vmem:[%s581_s0] sm:$0xff]  ;;  %v22_v1 = vld [vmem:[%s581_s0 + $0x8] sm:$0xff] }
   0x2   :  { %v25_v2 = vld [vmem:[%s581_s0 + $0x20] sm:$0xff]  ;;  %v30_v3 = vsel %vm29_vm0, %v21_v0, 0.0  ;;  %v33_v4 = vsel %vm29_vm0, %v22_v1, 0.0  ;;  %v26_v5 = vld [vmem:[%s581_s0 + $0x28] sm:$0xff] }
   0x3   :  { %31 = vadd.xlane.f32.xlu0 %v30_v3  ;;  %34 = vadd.xlane.f32.xlu1 %v33_v4  ;;  %v42_v6 = vsel %vm29_vm0, %v25_v2, 0.0  ;;  %v45_v7 = vsel %vm29_vm0, %v26_v5, 0.0 }
   0x4   :  { %10 = vsyncpa [#allocation3], 0  ;;  %v23_v8 = vld [vmem:[%s581_s0 + $0x10] sm:$0xff]  ;;  %v24_v12 = vld [vmem:[%s581_s0 + $0x18] sm:$0xff]  ;;  %s427_s19 = smov [#allocation2]  }
   0x5   :  { %v27_v9 = vld [vmem:[%s581_s0 + $0x30] sm:$0xff]  ;;  %v36_v10 = vsel %vm29_vm0, %v23_v8, 0.0  ;;  %v28_v13 = vld [vmem:[%s581_s0 + $0x38] sm:$0xff]  ;;  %v39_v14 = vsel %vm29_vm0, %v24_v12, 0.0  ;;  %v165_v56 = vld [vmem:[%s584_s3] sm:$0xff]  ;;  %s318_s20 = sshll.u32 %s427_s19, 4  ;;  %s319_s20 = int_to_ptr.vmem [resolvable:$true] %s318_s20 }
   0x6   :  { %v48_v11 = vsel %vm29_vm0, %v27_v9, 0.0  ;;  %v51_v15 = vsel %vm29_vm0, %v28_v13, 0.0  ;;  %v166_v57 = vld [vmem:[%s584_s3 + $0x8] sm:$0xff]  ;;  %v167_v59 = vld [vmem:[%s584_s3 + $0x10] sm:$0xff]  ;;  %v168_v60 = vld [vmem:[%s584_s3 + $0x18] sm:$0xff]  ;;  %p408_p1 = scmp.lt.s32.totalorder %s319_s20, %s319_s20 }
   0x7   :  { %43 = vadd.xlane.f32.xlu0 %v42_v6  ;;  %46 = vadd.xlane.f32.xlu1 %v45_v7  ;;  %v372_v58 = vpack.c.bf16 %v166_v57, %v165_v56  ;;  %v376_v61 = vpack.c.bf16 %v168_v60, %v167_v59 }
   0x9   :  { %373 = vmatprep.subr.bf16.mxu0 %v372_v58  ;;  %380 = vmatprep.subr.bf16.mxu1 %v372_v58 }
   0xa   :  { %375 = vmatpush3.bf16.msra.mxu0 %v372_v58  ;;  %382 = vmatpush3.bf16.msra.mxu1 %v372_v58 }
   0xb   :  { %37 = vadd.xlane.f32.xlu0 %v36_v10  ;;  %49 = vadd.xlane.f32.xlu1 %v48_v11 }
   0xc   :  { %377 = vmatprep.subr.bf16.mxu0 %v376_v61  ;;  %381 = vmatprep.subr.bf16.mxu1 %v376_v61 }
   0xe   :  { %379 = vmatpush3.bf16.msra.mxu0 %v376_v61  ;;  %383 = vmatpush3.bf16.msra.mxu1 %v376_v61 }
   0xf   :  { %40 = vadd.xlane.f32.xlu0 %v39_v14  ;;  %52 = vadd.xlane.f32.xlu1 %v51_v15 }
  0x90   :  { %v32_v16 = vpop.xlane.xlu0 %31  ;;  %v35_v17 = vpop.xlane.xlu1 %34 }
  0x91   :  { %v55_v18 = vmul.f32 0.03125, %v32_v16  ;;  %v56_v19 = vmul.f32 0.03125, %v35_v17 }
  0x93   :  { %v492_v20 = vsub.f32 %v21_v0, %v55_v18  ;;  %v494_v21 = vsub.f32 %v22_v1, %v56_v19 }
  0x94   :  { %v44_v22 = vpop.xlane.xlu0 %43  ;;  %v47_v23 = vpop.xlane.xlu1 %46 }
  0x95   :  { %v59_v24 = vmul.f32 0.03125, %v44_v22  ;;  %v60_v25 = vmul.f32 0.03125, %v47_v23  ;;  %v71_v26 = vmul.f32 %v492_v20, %v492_v20  ;;  %v72_v27 = vmul.f32 %v494_v21, %v494_v21  ;;  %v329_v22 = vld [vmem:[%s582_s1] ss:$0 sm:$0xff] }
  0x97   :  { %v500_v28 = vsub.f32 %v25_v2, %v59_v24  ;;  %v502_v29 = vsub.f32 %v26_v5, %v60_v25  ;;  %v79_v30 = vsel %vm29_vm0, %v71_v26, 0.0  ;;  %v82_v33 = vsel %vm29_vm0, %v72_v27, 0.0  ;;  %v330_v26 = vld [vmem:[%s583_s2] ss:$0 sm:$0xff] }
  0x98   :  { %80 = vadd.xlane.f32.xlu0 %v79_v30  ;;  %v38_v31 = vpop.xlane.xlu0 %37  ;;  %v50_v32 = vpop.xlane.xlu1 %49 }
  0x99   :  { %v57_v34 = vmul.f32 0.03125, %v38_v31  ;;  %v61_v35 = vmul.f32 0.03125, %v50_v32  ;;  %v75_v36 = vmul.f32 %v500_v28, %v500_v28  ;;  %v76_v37 = vmul.f32 %v502_v29, %v502_v29 }
  0x9b   :  { %v510_v38 = vsub.f32 %v23_v8, %v57_v34  ;;  %v512_v39 = vsub.f32 %v27_v9, %v61_v35  ;;  %v91_v40 = vsel %vm29_vm0, %v75_v36, 0.0  ;;  %v94_v43 = vsel %vm29_vm0, %v76_v37, 0.0 }
  0x9c   :  { %83 = vadd.xlane.f32.xlu0 %v82_v33  ;;  %92 = vadd.xlane.f32.xlu1 %v91_v40  ;;  %v41_v41 = vpop.xlane.xlu0 %40  ;;  %v53_v42 = vpop.xlane.xlu1 %52 }
  0x9d   :  { %v58_v44 = vmul.f32 0.03125, %v41_v41  ;;  %v62_v45 = vmul.f32 0.03125, %v53_v42  ;;  %v73_v46 = vmul.f32 %v510_v38, %v510_v38  ;;  %v77_v47 = vmul.f32 %v512_v39, %v512_v39 }
  0x9f   :  { %v520_v48 = vsub.f32 %v24_v12, %v58_v44  ;;  %v522_v49 = vsub.f32 %v28_v13, %v62_v45  ;;  %v85_v50 = vsel %vm29_vm0, %v73_v46, 0.0  ;;  %v97_v51 = vsel %vm29_vm0, %v77_v47, 0.0 }
  0xa0   :  { %95 = vadd.xlane.f32.xlu1 %v94_v43  ;;  %86 = vadd.xlane.f32.xlu0 %v85_v50 }
  0xa1   :  { %v74_v52 = vmul.f32 %v520_v48, %v520_v48  ;;  %v78_v53 = vmul.f32 %v522_v49, %v522_v49 }
  0xa3   :  { %v88_v54 = vsel %vm29_vm0, %v74_v52, 0.0  ;;  %v100_v55 = vsel %vm29_vm0, %v78_v53, 0.0 }
  0xa4   :  { %98 = vadd.xlane.f32.xlu1 %v97_v51  ;;  %89 = vadd.xlane.f32.xlu0 %v88_v54 }
  0xa8   :  { %101 = vadd.xlane.f32.xlu1 %v100_v55 }
 0x125   :  { %v81_v62 = vpop.xlane.xlu0 %80 }
 0x126   :  { %v103_v63 = vmul.f32 0.03125, %v81_v62 }
 0x128   :  { %v111_v0 = vadd.f32 1e-05, %v103_v63 }
 0x129   :  { %v93_v1 = vpop.xlane.xlu1 %92  ;;  %v84_v2 = vpop.xlane.xlu0 %83 }
 0x12a   :  { %387 = vrsqrt.f32 %v111_v0  ;;  %v107_v3 = vmul.f32 0.03125, %v93_v1  ;;  %v104_v4 = vmul.f32 0.03125, %v84_v2 }
 0x12c   :  { %v115_v5 = vadd.f32 1e-05, %v107_v3  ;;  %v112_v6 = vadd.f32 1e-05, %v104_v4 }
 0x12d   :  { %v96_v7 = vpop.xlane.xlu1 %95  ;;  %v87_v8 = vpop.xlane.xlu0 %86 }
 0x12e   :  { %389 = vrsqrt.f32 %v115_v5  ;;  %v108_v9 = vmul.f32 0.03125, %v96_v7  ;;  %v105_v10 = vmul.f32 0.03125, %v87_v8 }
 0x12f   :  { %391 = vrsqrt.f32 %v112_v6 }
 0x130   :  { %v116_v11 = vadd.f32 1e-05, %v108_v9  ;;  %v113_v12 = vadd.f32 1e-05, %v105_v10 }
 0x131   :  { %v99_v13 = vpop.xlane.xlu1 %98  ;;  %v90_v14 = vpop.xlane.xlu0 %89 }
 0x132   :  { %393 = vrsqrt.f32 %v116_v11  ;;  %v109_v15 = vmul.f32 0.03125, %v99_v13  ;;  %v106_v16 = vmul.f32 0.03125, %v90_v14 }
 0x133   :  { %395 = vrsqrt.f32 %v113_v12 }
 0x134   :  { %v388_v17 = vpop.eup %387  ;;  %v117_v18 = vadd.f32 1e-05, %v109_v15  ;;  %v114_v19 = vadd.f32 1e-05, %v106_v16 }
 0x135   :  { %v102_v23 = vpop.xlane.xlu1 %101  ;;  %v127_v24 = vmul.f32 %v388_v17, %v492_v20 }
 0x136   :  { %397 = vrsqrt.f32 %v117_v18  ;;  %v110_v25 = vmul.f32 0.03125, %v102_v23 }
 0x137   :  { %399 = vrsqrt.f32 %v114_v19  ;;  %v142_v27 = vmul.f32 %v329_v22, %v127_v24 }
 0x138   :  { %v390_v30 = vpop.eup %389  ;;  %v118_v31 = vadd.f32 1e-05, %v110_v25 }
 0x139   :  { %v392_v32 = vpop.eup %391  ;;  %v157_v33 = vadd.f32 %v330_v26, %v142_v27  ;;  %v131_v34 = vmul.f32 %v390_v30, %v500_v28 }
 0x13a   :  { %401 = vrsqrt.f32 %v118_v31  ;;  %v128_v35 = vmul.f32 %v392_v32, %v494_v21 }
 0x13b   :  { %360 = vmatprep.mubr.msk.f32.mxu0 %vm29_vm0, %v157_v33  ;;  %v146_v20 = vmul.f32 %v329_v22, %v131_v34 }
 0x13c   :  { %v394_v36 = vpop.eup %393  ;;  %v143_v37 = vmul.f32 %v329_v22, %v128_v35 }
 0x13d   :  { %v396_v40 = vpop.eup %395  ;;  %v161_v41 = vadd.f32 %v330_v26, %v146_v20  ;;  %v132_v42 = vmul.f32 %v394_v36, %v502_v29 }
 0x13e   :  { %v158_v43 = vadd.f32 %v330_v26, %v143_v37  ;;  %v129_v44 = vmul.f32 %v396_v40, %v510_v38 }
 0x13f   :  { %366 = vmatprep.mubr.msk.f32.mxu1 %vm29_vm0, %v161_v41  ;;  %v147_v45 = vmul.f32 %v329_v22, %v132_v42 }
 0x140   :  { %v398_v46 = vpop.eup %397  ;;  %361 = vmatmul.mubr.msk.f32.vlgmr.msra.gmra.mrb[0].mxu0 %vm29_vm0, %v158_v43  ;;  %v144_v28 = vmul.f32 %v329_v22, %v129_v44 }
 0x141   :  { %v400_v21 = vpop.eup %399  ;;  %v162_v47 = vadd.f32 %v330_v26, %v147_v45  ;;  %v133_v50 = vmul.f32 %v398_v46, %v512_v39 }
 0x142   :  { %v159_v51 = vadd.f32 %v330_v26, %v144_v28  ;;  %v130_v52 = vmul.f32 %v400_v21, %v520_v48  ;;  %v331_v48 = vld [vmem:[%s585_s4] ss:$0 sm:$0xff]  ;;  %s403_s4 = scalar_lea.vmem %s319_s20, 1024 }
 0x143   :  { %367 = vmatmul.mubr.msk.f32.vlgmr.msra.gmra.mrb[0].mxu1 %vm29_vm0, %v162_v47  ;;  %v148_v29 = vmul.f32 %v329_v22, %v133_v50  ;;  %p404_p0 = scmp.ne.s32.totalorder %s319_s20, %s403_s4  ;;  %p409_p2 = scmp.lt.s32.totalorder %s403_s4, %s403_s4 }
 0x144   :  { %v402_v53 = vpop.eup %401  ;;  %363 = vmatprep.mubr.msk.f32.mxu0 %vm29_vm0, %v159_v51  ;;  %v145_v38 = vmul.f32 %v329_v22, %v130_v52 }
 0x145   :  { %v163_v54 = vadd.f32 %v330_v26, %v148_v29  ;;  %v134_v55 = vmul.f32 %v402_v53, %v522_v49  ;;  %p410_p3 = por %p409_p2, %p408_p1 }
 0x146   :  { %v160_v56 = vadd.f32 %v330_v26, %v145_v38 }
 0x147   :  { %369 = vmatprep.mubr.msk.f32.mxu1 %vm29_vm0, %v163_v54  ;;  %v149_v57 = vmul.f32 %v329_v22, %v134_v55  ;;  %p411_p4 = pnand %p410_p3, %p404_p0 }
 0x148   :  { %364 = vmatmul.mubr.msk.f32.gmra.mrb[2].mxu0 %vm29_vm0, %v160_v56 }
 0x149   :  { %v164_v39 = vadd.f32 %v330_v26, %v149_v57 }
 0x14b   :  { %370 = vmatmul.mubr.msk.f32.gmra.mrb[2].mxu1 %vm29_vm0, %v164_v39 }
 0x213   :  { %v362_v58 = vpop.f32.mrb[0].mxu0 }
 0x214   :  { %v272_v59 = vadd.f32 %v362_v58, %v331_v48  ;;  %v266_v60 = vpop.f32.mrb[1].mxu0 }
 0x215   :  { %v267_v61 = vadd.f32 %v331_v48, %v266_v60 }
 0x216   :  { %306 = vst [vmem:[#allocation2 + $0x8] sm:$0xff] %v272_v59  ;;  %v368_v62 = vpop.f32.mrb[0].mxu1 }
 0x217   :  { %305 = vst [vmem:[#allocation2] sm:$0xff] %v267_v61  ;;  %v292_v49 = vadd.f32 %v368_v62, %v331_v48  ;;  %v286_v63 = vpop.f32.mrb[1].mxu1 }
 0x218   :  { %v287_v0 = vadd.f32 %v331_v48, %v286_v63 }
 0x219   :  { %310 = vst [vmem:[#allocation2 + $0x28] sm:$0xff] %v292_v49 }
 0x21a   :  { %309 = vst [vmem:[#allocation2 + $0x20] sm:$0xff] %v287_v0 }
 0x21b   :  { %v365_v1 = vpop.f32.mrb[2].mxu0 }
 0x21c   :  { %v282_v2 = vadd.f32 %v365_v1, %v331_v48  ;;  %v276_v3 = vpop.f32.mrb[3].mxu0 }
 0x21d   :  { %v277_v4 = vadd.f32 %v331_v48, %v276_v3 }
 0x21e   :  { %308 = vst [vmem:[#allocation2 + $0x18] sm:$0xff] %v282_v2  ;;  %v371_v5 = vpop.f32.mrb[2].mxu1 }
 0x21f   :  { %307 = vst [vmem:[#allocation2 + $0x10] sm:$0xff] %v277_v4  ;;  %v302_v6 = vadd.f32 %v371_v5, %v331_v48  ;;  %v296_v7 = vpop.f32.mrb[3].mxu1 }
 0x220   :  { %v297_v8 = vadd.f32 %v331_v48, %v296_v7 }
 0x221   :  { %312 = vst [vmem:[#allocation2 + $0x38] sm:$0xff] %v302_v6 }
 0x222   :  { %311 = vst [vmem:[#allocation2 + $0x30] sm:$0xff] %v297_v8 }
 0x223   :  { %414 = shalt.err (!%p411_p4)
}
 0x224   :  { %s415_s23 = scalar_lea.hbm %s586_s5, 1024 }
 0x225   :  { %p416_p5 = scmp.ne.s32.totalorder %s586_s5, %s415_s23  ;;  %p419_p6 = scmp.lt.u32.totalorder %s415_s23, %s586_s5 }
 0x227   :  { %p421_p7 = pnand %p419_p6, %p416_p5 }
 0x229   :  { %424 = shalt.err (!%p421_p7)
}
 0x22a   :  { %s428_s28 = smov 128   ;;  %s429_s29 = smov 8  }
 0x22b   :  { %324 = dma.vmem_to_hbm [thread:$0]  %s319_s20, 1024, %s586_s5, [#allocation3], %s428_s28, %s428_s28, %s429_s29  }
 0x22c   :  { %425 = dma.done.wait [#allocation3], 1024  }
 0x22d   :  { %426 = vsyncadd [#allocation3], 4294966272 }
 0x22e   :  { %328 = vsyncpa [#allocation3], 1 }

</bundles_post_ra>
